<compile_context>
chip_gen: v7x
topology: tpu7x:2x2x1
jax: 0.10.0
libtpu: 0.0.40
codegen_flags: <defaults>
</compile_context>

<pallas_src>
import functools

import jax
import jax.numpy as jnp
from jax.experimental import pallas as pl
from jax.experimental.pallas import tpu as pltpu


def _cdiv(a, b):
    return -(-a // b)


def _tpu_caps():
    """(vmem_capacity_bytes, has_two_tensorcores) with safe fallbacks."""
    vmem_cap = 64 << 20                       # conservative (v7x per-TC VMEM)
    try:
        vmem_cap = int(pltpu.get_tpu_info().vmem_capacity_bytes)
    except Exception:
        pass
    two_tc = False
    try:
        two_tc = "v7" in jax.devices()[0].device_kind.lower()
    except Exception:
        pass
    return vmem_cap, two_tc


def _vmem_budgets(max_block_bytes=None):
    vmem_cap, two_tc = _tpu_caps()
    # leave ~16 MiB headroom for weights / pipeline scratch / semaphores
    vmem_limit = max(32 << 20, min(vmem_cap - (16 << 20), 112 << 20))
    # x appears 4x in VMEM (in + out, each double-buffered) + weights/scratch
    block_budget = max(2 << 20, vmem_limit // 5)
    if max_block_bytes is not None:
        block_budget = max_block_bytes
    return vmem_limit, block_budget, two_tc


def _pick_nb(n, max_nb, two_tc):
    """Largest divisor of n fitting the budget (no batch padding)."""
    max_nb = int(max(1, min(n, max_nb)))
    divisors = [d for d in range(1, max_nb + 1) if n % d == 0]
    if two_tc and n >= 2:
        # keep >= 2 grid steps so both v7x TensorCores get work; prefer an
        # even step count so the "parallel" axis splits evenly across TCs.
        cand = [d for d in divisors if n // d >= 2]
        if cand:
            even = [d for d in cand if (n // d) % 2 == 0]
            return max(even) if even else max(cand)
    return max(divisors)


# ---------------------------------------------------------------------------
# Fused single-pass kernel: one read of x, one write of out.
# ---------------------------------------------------------------------------
def _scse_fused_kernel(x_ref, w1t_ref, b1_ref, w2t_ref, b2_ref, ws_ref, bs_ref,
                       o_ref, *, inv_hw):
    x = x_ref[...]                                        # (nb, C, HW)

    # cSE: AdaptiveAvgPool2d(1) -> 1x1 conv -> ReLU -> 1x1 conv -> Sigmoid
    pooled = jnp.sum(x, axis=2) * inv_hw                  # (nb, C)
    h = jnp.dot(pooled, w1t_ref[...],
                preferred_element_type=jnp.float32) + b1_ref[...]
    h = jnp.maximum(h, 0.0)
    g = jnp.dot(h, w2t_ref[...],
                preferred_element_type=jnp.float32) + b2_ref[...]
    g = jax.nn.sigmoid(g)                                 # (nb, C)

    # sSE: 1x1 conv C->1 + Sigmoid as VPU multiply + sublane reduction
    ws = ws_ref[...]                                      # (C, 1)
    s = jnp.sum(x * ws[None, :, :], axis=1, keepdims=True) + bs_ref[0]
    s = jax.nn.sigmoid(s)                                 # (nb, 1, HW)

    # fused combine: x*cSE + x*sSE == x * (cSE + sSE)
    o_ref[...] = x * (g[:, :, None] + s)


# ---------------------------------------------------------------------------
# Two-pass fallback for large C*HW (e.g. v7x 64 MiB VMEM).
# ---------------------------------------------------------------------------
def _channel_sum_kernel(x_ref, sums_ref, *, hw, hw_tile, needs_mask):
    t = pl.program_id(1)
    x = x_ref[...]                                        # (1, C, hw_tile)
    if needs_mask:
        lane = jax.lax.broadcasted_iota(jnp.int32, x.shape, 2)
        x = jnp.where(lane < (hw - t * hw_tile), x, 0.0)

    @pl.when(t == 0)
    def _():
        sums_ref[...] = jnp.zeros_like(sums_ref)

    sums_ref[...] += jnp.sum(x, axis=2, keepdims=True)    # (1, C, 1)


def _apply_gates_kernel(x_ref, g_ref, ws_ref, bs_ref, o_ref):
    x = x_ref[...]                                        # (1, C, hw_tile)
    g = g_ref[...]                                        # (1, C, 1) cSE gate
    ws = ws_ref[...]                                      # (C, 1)
    s = jnp.sum(x * ws[None, :, :], axis=1, keepdims=True) + bs_ref[0]
    s = jax.nn.sigmoid(s)                                 # (1, 1, hw_tile)
    o_ref[...] = x * (g + s)


# ---------------------------------------------------------------------------
# Wrapper
# ---------------------------------------------------------------------------
def scse_forward(x_nchw, params, *, max_block_bytes=None):
    """x_nchw: (N, C, H, W) float32. params: (w1t, b1, w2t, b2, ws, bs)."""
    N, C, H, W = x_nchw.shape
    HW = H * W
    w1t, b1, w2t, b2, ws, bs = params
    Hid = w1t.shape[1]

    x = x_nchw.reshape(N, C, HW)
    vmem_limit, block_budget, two_tc = _vmem_budgets(max_block_bytes)

    # VMEM footprint of one (1, C, HW) slice with (8, 128) layout padding.
    per_batch = _cdiv(C, 8) * 8 * _cdiv(HW, 128) * 128 * 4

    if per_batch <= block_budget:
        # ---------------- fused single-pass path ----------------
        nb = _pick_nb(N, block_budget // per_batch, two_tc)
        grid = (N // nb,)
        out = pl.pallas_call(
            functools.partial(_scse_fused_kernel, inv_hw=float(1.0 / HW)),
            out_shape=jax.ShapeDtypeStruct((N, C, HW), x.dtype),
            grid_spec=pltpu.PrefetchScalarGridSpec(
                num_scalar_prefetch=0,
                grid=grid,
                in_specs=[
                    pl.BlockSpec((nb, C, HW), lambda n: (n, 0, 0)),   # x block
                    pl.BlockSpec((C, Hid), lambda n: (0, 0)),         # W1^T
                    pl.BlockSpec((1, Hid), lambda n: (0, 0)),         # b1
                    pl.BlockSpec((Hid, C), lambda n: (0, 0)),         # W2^T
                    pl.BlockSpec((1, C), lambda n: (0, 0)),           # b2
                    pl.BlockSpec((C, 1), lambda n: (0, 0)),           # Ws
                    pl.BlockSpec(memory_space=pltpu.MemorySpace.SMEM),  # bs
                ],
                out_specs=pl.BlockSpec((nb, C, HW), lambda n: (n, 0, 0)),
            ),
            compiler_params=pltpu.CompilerParams(
                dimension_semantics=("parallel",),
                vmem_limit_bytes=vmem_limit),
        )(x, w1t, b1, w2t, b2, ws, bs)
        return out.reshape(N, C, H, W)

    # ---------------- two-pass HW-tiled fallback ----------------
    # TODO(synk): if C alone is so large that a (1, C, 128) tile overflows
    # VMEM, the sSE reduction would also need channel tiling (not handled).
    lanes = max(1, block_budget // (_cdiv(C, 8) * 8 * 4))
    hw_tile = min(_cdiv(HW, 128) * 128, max(128, (lanes // 128) * 128))
    gT = _cdiv(HW, hw_tile)
    needs_mask = (HW % hw_tile) != 0

    # Pass 1: per-(n, c) channel sums (HW is the reduction grid axis).
    sums = pl.pallas_call(
        functools.partial(_channel_sum_kernel, hw=HW, hw_tile=hw_tile,
                          needs_mask=needs_mask),
        out_shape=jax.ShapeDtypeStruct((N, C, 1), jnp.float32),
        grid_spec=pltpu.PrefetchScalarGridSpec(
            num_scalar_prefetch=0,
            grid=(N, gT),
            in_specs=[pl.BlockSpec((1, C, hw_tile), lambda n, t: (n, 0, t))],
            out_specs=pl.BlockSpec((1, C, 1), lambda n, t: (n, 0, 0)),
        ),
        compiler_params=pltpu.CompilerParams(
            dimension_semantics=("parallel", "arbitrary"),
            vmem_limit_bytes=vmem_limit),
    )(x)

    # Tiny O(N*C) cSE gate in plain JAX.
    pooled = sums[:, :, 0] * (1.0 / HW)                       # (N, C)
    hcse = jnp.maximum(pooled @ w1t + b1, 0.0)
    g = jax.nn.sigmoid(hcse @ w2t + b2)[:, :, None]           # (N, C, 1)

    # Pass 2: re-stream x in HW tiles, apply x * (cSE + sSE).
    out = pl.pallas_call(
        _apply_gates_kernel,
        out_shape=jax.ShapeDtypeStruct((N, C, HW), x.dtype),
        grid_spec=pltpu.PrefetchScalarGridSpec(
            num_scalar_prefetch=0,
            grid=(N, gT),
            in_specs=[
                pl.BlockSpec((1, C, hw_tile), lambda n, t: (n, 0, t)),  # x
                pl.BlockSpec((1, C, 1), lambda n, t: (n, 0, 0)),        # g
                pl.BlockSpec((C, 1), lambda n, t: (0, 0)),              # Ws
                pl.BlockSpec(memory_space=pltpu.MemorySpace.SMEM),      # bs
            ],
            out_specs=pl.BlockSpec((1, C, hw_tile), lambda n, t: (n, 0, t)),
        ),
        compiler_params=pltpu.CompilerParams(
            dimension_semantics=("parallel", "parallel"),
            vmem_limit_bytes=vmem_limit),
    )(x, g, ws, bs)
    return out.reshape(N, C, H, W)


# ---------------------------------------------------------------------------
# Synthetic parameters + pure-JAX reference
# ---------------------------------------------------------------------------
def make_params(key, in_channels, reduction=16, hid_pad=8):
    """Deterministic synthetic weights matching SCSEModule.__init__ shapes.

    True hidden width is in_channels // reduction; it is zero-padded up to
    `hid_pad` (padded cols of W1^T / b1 and padded rows of W2^T are zero, so
    ReLU(0)=0 contributes nothing -> math identical to the unpadded module).
    Weights are stored pre-transposed so the kernel computes (Nb,C)@(C,Hid).
    """
    hid = in_channels // reduction
    assert hid >= 1, "in_channels must be >= reduction"
    k1, k2, k3, k4, k5, k6 = jax.random.split(key, 6)
    w1_r = jax.random.normal(k1, (hid, in_channels), jnp.float32) * 0.1
    b1_r = jax.random.normal(k2, (hid,), jnp.float32) * 0.1
    w2_r = jax.random.normal(k3, (in_channels, hid), jnp.float32) * 0.1
    b2_r = jax.random.normal(k4, (in_channels,), jnp.float32) * 0.1
    ws_r = jax.random.normal(k5, (1, in_channels), jnp.float32) * 0.1
    bs_r = jax.random.normal(k6, (), jnp.float32) * 0.1

    hp = max(hid_pad, hid)
    w1t = jnp.zeros((in_channels, hp), jnp.float32).at[:, :hid].set(w1_r.T)
    b1 = jnp.zeros((1, hp), jnp.float32).at[0, :hid].set(b1_r)
    w2t = jnp.zeros((hp, in_channels), jnp.float32).at[:hid, :].set(w2_r.T)
    b2 = b2_r.reshape(1, in_channels)
    ws = ws_r.reshape(in_channels, 1)
    bs = bs_r.reshape(1)

    kernel_params = (w1t, b1, w2t, b2, ws, bs)
    real_params = (w1_r, b1_r, w2_r, b2_r, ws_r, bs_r)
    return kernel_params, real_params


def scse_reference(x, real_params):
    """Pure-JAX reference mirroring the PyTorch forward."""
    w1_r, b1_r, w2_r, b2_r, ws_r, bs_r = real_params
    pooled = x.mean(axis=(2, 3))                                # (N, C)
    h = jnp.maximum(pooled @ w1_r.T + b1_r, 0.0)                # (N, hid)
    g = jax.nn.sigmoid(h @ w2_r.T + b2_r)                       # (N, C)
    s = jax.nn.sigmoid(jnp.einsum("nchw,c->nhw", x, ws_r[0]) + bs_r)
    return x * g[:, :, None, None] + x * s[:, None, :, :]


if __name__ == "__main__":
    key = jax.random.PRNGKey(0)
    kx, kp, kx2 = jax.random.split(key, 3)

    # Case 1: fused single-pass path (HW a multiple of 128).
    N, C, H, W = 2, 32, 16, 16
    x = jax.random.normal(kx, (N, C, H, W), jnp.float32)
    kernel_params, real_params = make_params(kp, in_channels=C, reduction=16)
    out = jax.block_until_ready(scse_forward(x, kernel_params))
    ref = scse_reference(x, real_params)
    assert out.shape == (N, C, H, W)
    assert jnp.allclose(out, ref, atol=1e-5, rtol=1e-5), "fused path mismatch"

    # Case 2: non-128-multiple spatial dim (block = full HW, masked edge store).
    x2 = jax.random.normal(kx2, (N, C, 15, 15), jnp.float32)
    out2 = jax.block_until_ready(scse_forward(x2, kernel_params))
    ref2 = scse_reference(x2, real_params)
    assert jnp.allclose(out2, ref2, atol=1e-5, rtol=1e-5), "ragged HW mismatch"

    # Case 3: force the two-pass HW-tiled fallback (large-C*HW / v7x path).
    out3 = jax.block_until_ready(
        scse_forward(x2, kernel_params, max_block_bytes=16 * 1024))
    assert jnp.allclose(out3, ref2, atol=1e-5, rtol=1e-5), "two-pass mismatch"

    print("KERNEL_OK")
</pallas_src>

<mosaic_0001>
module attributes {stable_mosaic.version = 11 : i64} {
  func.func @_scse_fused_kernel(%arg0: i32, %arg1: memref<2x32x256xf32, #tpu.memory_space<vmem>>, %arg2: memref<32x8xf32, #tpu.memory_space<vmem>>, %arg3: memref<1x8xf32, #tpu.memory_space<vmem>>, %arg4: memref<8x32xf32, #tpu.memory_space<vmem>>, %arg5: memref<1x32xf32, #tpu.memory_space<vmem>>, %arg6: memref<32x1xf32, #tpu.memory_space<vmem>>, %arg7: memref<1xf32, #tpu.memory_space<smem>>, %arg8: memref<2x32x256xf32, #tpu.memory_space<vmem>>) attributes {dimension_semantics = [#tpu.dimension_semantics<parallel>], iteration_bounds = array<i64: 1>, scalar_prefetch = 0 : i64, scratch_operands = 0 : i64, tpu.core_type = #tpu.core_type<tc>, window_params = [{transform_indices = @transform_0, window_bounds = array<i64: 2, 32, 256>}, {pipeline_mode = #tpu.pipeline_mode<synchronous>, transform_indices = @transform_1, window_bounds = array<i64: 32, 8>}, {pipeline_mode = #tpu.pipeline_mode<synchronous>, transform_indices = @transform_2, window_bounds = array<i64: 1, 8>}, {pipeline_mode = #tpu.pipeline_mode<synchronous>, transform_indices = @transform_3, window_bounds = array<i64: 8, 32>}, {pipeline_mode = #tpu.pipeline_mode<synchronous>, transform_indices = @transform_4, window_bounds = array<i64: 1, 32>}, {pipeline_mode = #tpu.pipeline_mode<synchronous>, transform_indices = @transform_5, window_bounds = array<i64: 32, 1>}, {transform_indices = @transform_6, window_bounds = array<i64: 1>}, {transform_indices = @transform_7, window_bounds = array<i64: 2, 32, 256>}]} {
    %c0 = arith.constant 0 : index
    %c0_0 = arith.constant 0 : index
    %c0_1 = arith.constant 0 : index
    %0 = vector.load %arg1[%c0, %c0_0, %c0_1] : memref<2x32x256xf32, #tpu.memory_space<vmem>>, vector<2x32x256xf32>
    %cst = arith.constant dense<0.000000e+00> : vector<2x32xf32>
    %1 = vector.multi_reduction <add>, %0, %cst [2] : vector<2x32x256xf32> to vector<2x32xf32>
    %cst_2 = arith.constant 3.906250e-03 : f32
    %2 = vector.broadcast %cst_2 : f32 to vector<2x32xf32>
    %3 = arith.mulf %1, %2 : vector<2x32xf32>
    %c0_3 = arith.constant 0 : index
    %c0_4 = arith.constant 0 : index
    %4 = vector.load %arg2[%c0_3, %c0_4] : memref<32x8xf32, #tpu.memory_space<vmem>>, vector<32x8xf32>
    %cst_5 = arith.constant dense<0.000000e+00> : vector<2x8xf32>
    %5 = tpu.matmul %3, %4, %cst_5 {dimension_numbers = #tpu.dot_dimension_numbers<[1], [0], [0], [1], [0, 0, 1, 1], [], []>} : vector<2x32xf32>, vector<32x8xf32>, vector<2x8xf32> -> vector<2x8xf32>
    %c0_6 = arith.constant 0 : index
    %c0_7 = arith.constant 0 : index
    %6 = vector.load %arg3[%c0_6, %c0_7] : memref<1x8xf32, #tpu.memory_space<vmem>>, vector<1x8xf32>
    %7 = vector.broadcast %6 : vector<1x8xf32> to vector<2x8xf32>
    %8 = arith.addf %5, %7 : vector<2x8xf32>
    %cst_8 = arith.constant 0.000000e+00 : f32
    %9 = vector.broadcast %cst_8 : f32 to vector<2x8xf32>
    %10 = arith.maximumf %8, %9 : vector<2x8xf32>
    %c0_9 = arith.constant 0 : index
    %c0_10 = arith.constant 0 : index
    %11 = vector.load %arg4[%c0_9, %c0_10] : memref<8x32xf32, #tpu.memory_space<vmem>>, vector<8x32xf32>
    %cst_11 = arith.constant dense<0.000000e+00> : vector<2x32xf32>
    %12 = tpu.matmul %10, %11, %cst_11 {dimension_numbers = #tpu.dot_dimension_numbers<[1], [0], [0], [1], [0, 0, 1, 1], [], []>} : vector<2x8xf32>, vector<8x32xf32>, vector<2x32xf32> -> vector<2x32xf32>
    %c0_12 = arith.constant 0 : index
    %c0_13 = arith.constant 0 : index
    %13 = vector.load %arg5[%c0_12, %c0_13] : memref<1x32xf32, #tpu.memory_space<vmem>>, vector<1x32xf32>
    %14 = vector.broadcast %13 : vector<1x32xf32> to vector<2x32xf32>
    %15 = arith.addf %12, %14 : vector<2x32xf32>
    %16 = arith.negf %15 : vector<2x32xf32>
    %17 = math.exp %16 : vector<2x32xf32>
    %cst_14 = arith.constant 1.000000e+00 : f32
    %18 = vector.broadcast %cst_14 : f32 to vector<2x32xf32>
    %19 = arith.addf %18, %17 : vector<2x32xf32>
    %20 = arith.divf %18, %19 : vector<2x32xf32>
    %c0_15 = arith.constant 0 : index
    %c0_16 = arith.constant 0 : index
    %21 = vector.load %arg6[%c0_15, %c0_16] : memref<32x1xf32, #tpu.memory_space<vmem>>, vector<32x1xf32>
    %22 = vector.shape_cast %21 : vector<32x1xf32> to vector<1x32x1xf32>
    %23 = vector.broadcast %22 : vector<1x32x1xf32> to vector<2x32x256xf32>
    %24 = arith.mulf %0, %23 : vector<2x32x256xf32>
    %cst_17 = arith.constant dense<0.000000e+00> : vector<2x256xf32>
    %25 = vector.multi_reduction <add>, %24, %cst_17 [1] : vector<2x32x256xf32> to vector<2x256xf32>
    %26 = vector.shape_cast %25 : vector<2x256xf32> to vector<2x1x256xf32>
    %c0_18 = arith.constant 0 : index
    %27 = memref.load %arg7[%c0_18] : memref<1xf32, #tpu.memory_space<smem>>
    %28 = vector.broadcast %27 : f32 to vector<2x1x256xf32>
    %29 = arith.addf %26, %28 : vector<2x1x256xf32>
    %30 = arith.negf %29 : vector<2x1x256xf32>
    %31 = math.exp %30 : vector<2x1x256xf32>
    %cst_19 = arith.constant 1.000000e+00 : f32
    %32 = vector.broadcast %cst_19 : f32 to vector<2x1x256xf32>
    %33 = arith.addf %32, %31 : vector<2x1x256xf32>
    %34 = arith.divf %32, %33 : vector<2x1x256xf32>
    %35 = vector.shape_cast %20 : vector<2x32xf32> to vector<2x32x1xf32>
    %36 = vector.broadcast %35 : vector<2x32x1xf32> to vector<2x32x256xf32>
    %37 = vector.broadcast %34 : vector<2x1x256xf32> to vector<2x32x256xf32>
    %38 = arith.addf %36, %37 : vector<2x32x256xf32>
    %39 = arith.mulf %0, %38 : vector<2x32x256xf32>
    %c0_20 = arith.constant 0 : index
    %c0_21 = arith.constant 0 : index
    %c0_22 = arith.constant 0 : index
    %40 = vector.load %arg8[%c0_20, %c0_21, %c0_22] : memref<2x32x256xf32, #tpu.memory_space<vmem>>, vector<2x32x256xf32>
    tpu.vector_store %arg8[%c0_20, %c0_21, %c0_22], %39 {strides = array<i32>} : memref<2x32x256xf32, #tpu.memory_space<vmem>>, vector<2x32x256xf32>,
    return
  }
  func.func @transform_0(%arg0: i32) -> (i32, i32, i32) {
    %c0_i32 = arith.constant 0 : i32
    %c0_i32_0 = arith.constant 0 : i32
    %c0_i32_1 = arith.constant 0 : i32
    return %arg0, %c0_i32, %c0_i32_0 : i32, i32, i32
  }
  func.func @transform_1(%arg0: i32) -> (i32, i32) {
    %c0_i32 = arith.constant 0 : i32
    %c0_i32_0 = arith.constant 0 : i32
    %c0_i32_1 = arith.constant 0 : i32
    return %c0_i32, %c0_i32_0 : i32, i32
  }
  func.func @transform_2(%arg0: i32) -> (i32, i32) {
    %c0_i32 = arith.constant 0 : i32
    %c0_i32_0 = arith.constant 0 : i32
    %c0_i32_1 = arith.constant 0 : i32
    return %c0_i32, %c0_i32_0 : i32, i32
  }
  func.func @transform_3(%arg0: i32) -> (i32, i32) {
    %c0_i32 = arith.constant 0 : i32
    %c0_i32_0 = arith.constant 0 : i32
    %c0_i32_1 = arith.constant 0 : i32
    return %c0_i32, %c0_i32_0 : i32, i32
  }
  func.func @transform_4(%arg0: i32) -> (i32, i32) {
    %c0_i32 = arith.constant 0 : i32
    %c0_i32_0 = arith.constant 0 : i32
    %c0_i32_1 = arith.constant 0 : i32
    return %c0_i32, %c0_i32_0 : i32, i32
  }
  func.func @transform_5(%arg0: i32) -> (i32, i32) {
    %c0_i32 = arith.constant 0 : i32
    %c0_i32_0 = arith.constant 0 : i32
    %c0_i32_1 = arith.constant 0 : i32
    return %c0_i32, %c0_i32_0 : i32, i32
  }
  func.func @transform_6(%arg0: i32) -> i32 {
    %c0_i32 = arith.constant 0 : i32
    %c0_i32_0 = arith.constant 0 : i32
    return %c0_i32 : i32
  }
  func.func @transform_7(%arg0: i32) -> (i32, i32, i32) {
    %c0_i32 = arith.constant 0 : i32
    %c0_i32_0 = arith.constant 0 : i32
    %c0_i32_1 = arith.constant 0 : i32
    return %arg0, %c0_i32, %c0_i32_0 : i32, i32, i32
  }
}

</mosaic_0001>

<bundles_post_ra>
// kernel: tpu_custom_call.1
= control target key start
LH: loop header
LB: loop body
LE: loop exit
PB: predicated region body
PF: predicated region fallthrough
CT: control target
= control target key end

     0   :  { %13 = vsyncpa [#allocation4], 0  ;;  %s846_s0 = inlined_call_operand.hbm [shape: f32[2,32,256], index: 0, kind: input, shape index: {}]   ;;  %s847_s1 = inlined_call_operand.vmem [shape: f32[32,8], index: 1, kind: input, shape index: {}]   ;;  %s848_s2 = inlined_call_operand.vmem [shape: f32[1,8], index: 2, kind: input, shape index: {}]   ;;  %s849_s3 = inlined_call_operand.vmem [shape: f32[8,32], index: 3, kind: input, shape index: {}]   ;;  %s850_s4 = inlined_call_operand.vmem [shape: f32[1,32], index: 4, kind: input, shape index: {}]   ;;  %s851_s5 = inlined_call_operand.vmem [shape: f32[32,1], index: 5, kind: input, shape index: {}]   ;;  %s852_s6 = inlined_call_operand.<no memory space> [shape: f32[1], index: 6, kind: input, shape index: {}]   ;;  %s853_s7 = inlined_call_operand.hbm [shape: f32[2,32,256], index: 7, kind: output, shape index: {}]  }
   0x1   :  { %14 = vsyncpa [#allocation5], 0  ;;  %s644_s24 = smov [#allocation3]   ;;  %s596_s28 = scalar_lea.hbm %s846_s0, 2048 }
   0x2   :  { %s20_s25 = sshll.u32 %s644_s24, 4  ;;  %p597_p0 = scmp.ne.s32.totalorder %s846_s0, %s596_s28  ;;  %s21_s25 = int_to_ptr.vmem [resolvable:$true] %s20_s25 }
   0x3   :  { %p600_p1 = scmp.lt.u32.totalorder %s596_s28, %s846_s0 }
   0x5   :  { %p602_p2 = pnand %p600_p1, %p597_p0 }
   0x7   :  { %605 = shalt.err (!%p602_p2)
}
   0x8   :  { %s606_s10 = scalar_lea.vmem %s21_s25, 2048  ;;  %p611_p4 = scmp.lt.s32.totalorder %s21_s25, %s21_s25 }
   0x9   :  { %p607_p3 = scmp.ne.s32.totalorder %s21_s25, %s606_s10  ;;  %p612_p5 = scmp.lt.s32.totalorder %s606_s10, %s606_s10 }
   0xb   :  { %p613_p6 = por %p612_p5, %p611_p4 }
   0xd   :  { %p614_p7 = pnand %p613_p6, %p607_p3 }
   0xf   :  { %617 = shalt.err (!%p614_p7)
}
  0x10   :  { %s645_s11 = smov 256   ;;  %s646_s12 = smov 16  }
  0x11   :  { %26 = dma.hbm_to_vmem [thread:$0]  %s846_s0, 2048, %s21_s25, [#allocation4], %s645_s11, %s645_s11, %s646_s12  }
  0x12   :  { %640 = dma.done.wait [#allocation4], 2048  }
  0x13   :  { %641 = vsyncadd [#allocation4], 4294965248  ;;  %v707_v0 = vld [vmem:[#allocation3 + $0x40] sm:$0xff]  ;;  %v709_v1 = vld [vmem:[#allocation3 + $0x48] sm:$0xff]  ;;  %v647_v27 = vmov 0.0|0.0   ;;  %vm648_vm0 = vmmov 0   ;;  %v109_v32 = vlaneseq }
  0x14   :  { %v711_v2 = vld [vmem:[#allocation3] sm:$0xff]  ;;  %v70_v3 = vadd.f32 %v709_v1, %v707_v0  ;;  %v715_v4 = vld [vmem:[#allocation3 + $0x8] sm:$0xff]  ;;  %v717_v5 = vld [vmem:[#allocation3 + $0x50] sm:$0xff]  ;;  %560 = vmatprep.subr.bf16.mxu0 %v647_v27  ;;  %v649_v31 = vmov 0.0   ;;  %vm120_vm1 = vcmask 130112   ;;  %vm127_vm2 = vcmask 195712  }
  0x15   :  { %v719_v6 = vld [vmem:[#allocation3 + $0x58] sm:$0xff]  ;;  %v58_v7 = vadd.f32 %v715_v4, %v711_v2  ;;  %v723_v8 = vld [vmem:[#allocation3 + $0x10] sm:$0xff]  ;;  %v731_v12 = vld [vmem:[#allocation3 + $0x60] sm:$0xff]  ;;  %552 = vmatprep.mubr.msk.f32.mxu0 %vm648_vm0, %v649_v31  ;;  %555 = vmatprep.subr.mxu1 %v649_v31  ;;  %v110_v34 = vand.u32 127, %v109_v32  ;;  %v767_v39 = vshrl.u32 %v109_v32, 7  ;;  %vm134_vm3 = vcmask 261312  }
  0x16   :  { %v725_v9 = vld [vmem:[#allocation3 + $0x18] sm:$0xff]  ;;  %71 = vadd.xlane.f32.xlu1 %v70_v3  ;;  %v73_v10 = vadd.f32 %v719_v6, %v717_v5  ;;  %v733_v13 = vld [vmem:[#allocation3 + $0x68] sm:$0xff]  ;;  %v735_v14 = vld [vmem:[#allocation3 + $0x20] sm:$0xff]  ;;  %557 = vmatprep.mubr.msk.f32.mxu1 %vm648_vm0, %v649_v31  ;;  %vm155_vm4 = vcmask 1041409   ;;  %vm157_vm5 = vcmask 261120   ;;  %vm239_vm6 = vcmask 64512  }
  0x17   :  { %59 = vadd.xlane.f32.xlu0 %v58_v7  ;;  %v61_v11 = vadd.f32 %v725_v9, %v723_v8  ;;  %v737_v15 = vld [vmem:[#allocation3 + $0x28] sm:$0xff]  ;;  %v76_v16 = vadd.f32 %v733_v13, %v731_v12  ;;  %v743_v18 = vld [vmem:[#allocation3 + $0x70] sm:$0xff]  ;;  %v745_v19 = vld [vmem:[#allocation3 + $0x78] sm:$0xff]  ;;  %v115_v36 = vadd.s32 4294967288, %v110_v34  ;;  %v122_v38 = vadd.s32 4294967280, %v110_v34 }
  0x18   :  { %v64_v17 = vadd.f32 %v737_v15, %v735_v14  ;;  %v747_v20 = vld [vmem:[#allocation3 + $0x30] sm:$0xff]  ;;  %v749_v21 = vld [vmem:[#allocation3 + $0x38] sm:$0xff]  ;;  %v79_v22 = vadd.f32 %v745_v19, %v743_v18  ;;  %v90_v24 = vld [vmem:[%s847_s1] sm:$0xff]  ;;  %v129_v43 = vadd.s32 4294967272, %v110_v34  ;;  %v113_v47 = vsub.s32 %v110_v34, %v767_v39 }
  0x19   :  { %v67_v23 = vadd.f32 %v749_v21, %v747_v20  ;;  %v91_v25 = vld [vmem:[%s847_s1 + $0x8] sm:$0xff]  ;;  %v92_v28 = vld [vmem:[%s847_s1 + $0x10] sm:$0xff]  ;;  %v93_v29 = vld [vmem:[%s847_s1 + $0x18] sm:$0xff]  ;;  %v118_v41 = vsub.s32 %v115_v36, %v767_v39  ;;  %v125_v45 = vsub.s32 %v122_v38, %v767_v39 }
  0x1a   :  { %74 = vadd.xlane.f32.xlu1 %v73_v10  ;;  %v561_v26 = vpack.c.bf16 %v91_v25, %v90_v24  ;;  %v564_v30 = vpack.c.bf16 %v93_v29, %v92_v28  ;;  %v132_v54 = vsub.s32 %v129_v43, %v767_v39  ;;  %v231_v25 = vld [vmem:[%s849_s3] sm:$0xff]  ;;  %v650_v28 = vmov 0   ;;  %v321_v29 = vld [vmem:[%s851_s5 + $0x10] sm:$0xff] }
  0x1b   :  { %62 = vadd.xlane.f32.xlu0 %v61_v11  ;;  %556 = vmatpush3.msra.mxu1 %v231_v25  ;;  %v528_v31 = vld [vmem:[%s848_s2] ss:$0 sm:$0xff] }
  0x1c   :  { %562 = vmatpush3.bf16.msra.mxu0 %v561_v26  ;;  %v320_v26 = vld [vmem:[%s851_s5 + $0x8] sm:$0xff]  ;;  %575 = vset.pattern.permute.xlu1 %v650_v28  ;;  %v530_v36 = vld [vmem:[%s850_s4] ss:$0 sm:$0xff] }
  0x1d   :  { %563 = vmatprep.subr.bf16.mxu0 %v647_v27  ;;  %v319_v27 = vld [vmem:[%s851_s5] sm:$0xff]  ;;  %574 = vset.pattern.permute.xlu0 %v650_v28 }
  0x1e   :  { %77 = vadd.xlane.f32.xlu1 %v76_v16 }
  0x1f   :  { %65 = vadd.xlane.f32.xlu0 %v64_v17 }
  0x20   :  { %565 = vmatpush3.bf16.msra.mxu0 %v564_v30  ;;  %v322_v30 = vld [vmem:[%s851_s5 + $0x18] sm:$0xff]  ;;  %s651_s5 = smov [#allocation6]  }
  0x22   :  { %80 = vadd.xlane.f32.xlu1 %v79_v22 }
  0x23   :  { %68 = vadd.xlane.f32.xlu0 %v67_v23 }
  0x33   :  { %330 = vperm.xlu1 %575, %v320_v26  }
  0x37   :  { %335 = vperm.xlu1 %575, %v321_v29  }
  0x39   :  { %325 = vperm.xlu0 %574, %v319_v27  }
  0x3b   :  { %340 = vperm.xlu1 %575, %v322_v30  }
  0xa3   :  { %v72_v33 = vpop.xlane.xlu1 %71 }
  0xa4   :  { %v60_v35 = vpop.xlane.xlu0 %59  ;;  %v86_v48 = vmul.f32 0.00390625, %v72_v33 }
  0xa5   :  { %v82_v51 = vmul.f32 0.00390625, %v60_v35 }
  0xa6   :  { %v139_v58 = vrot.slane %v86_v48, %v113_v47 }
  0xa7   :  { %v75_v37 = vpop.xlane.xlu1 %74  ;;  %v114_v62 = vrot.slane %v82_v51, %v113_v47 }
  0xa8   :  { %v63_v40 = vpop.xlane.xlu0 %62  ;;  %v87_v42 = vmul.f32 0.00390625, %v75_v37 }
  0xa9   :  { %v83_v44 = vmul.f32 0.00390625, %v63_v40 }
  0xaa   :  { %v143_v53 = vrot.slane %v87_v42, %v118_v41 }
  0xab   :  { %v78_v46 = vpop.xlane.xlu1 %77  ;;  %v119_v55 = vrot.slane %v83_v44, %v118_v41  ;;  %v446_v44 = vsub.s32 1, %v767_v39 }
  0xac   :  { %v88_v49 = vmul.f32 0.00390625, %v78_v46  ;;  %v66_v50 = vpop.xlane.xlu0 %65  ;;  %v144_v3 = vsel %vm120_vm1, %v143_v53, %v139_v58 }
  0xad   :  { %v84_v52 = vmul.f32 0.00390625, %v66_v50  ;;  %v121_v10 = vsel %vm120_vm1, %v119_v55, %v114_v62 }
  0xae   :  { %v148_v56 = vrot.slane %v88_v49, %v125_v45 }
  0xaf   :  { %v81_v57 = vpop.xlane.xlu1 %80  ;;  %v126_v59 = vrot.slane %v84_v52, %v125_v45  ;;  %v427_v45 = vsub.s32 0, %v767_v39 }
  0xb0   :  { %v89_v60 = vmul.f32 0.00390625, %v81_v57  ;;  %v69_v61 = vpop.xlane.xlu0 %68  ;;  %v149_v11 = vsel %vm127_vm2, %v148_v56, %v144_v3 }
  0xb1   :  { %v85_v63 = vmul.f32 0.00390625, %v69_v61  ;;  %v128_v17 = vsel %vm127_vm2, %v126_v59, %v121_v10 }
  0xb2   :  { %v153_v7 = vrot.slane %v89_v60, %v132_v54 }
  0xb3   :  { %v133_v16 = vrot.slane %v85_v63, %v132_v54  ;;  %v331_v49 = vpop.permute.xlu1 %330 }
  0xb4   :  { %v154_v22 = vsel %vm134_vm3, %v153_v7, %v149_v11  ;;  %v345_v52 = vmul.f32 %v331_v49, %v723_v8  ;;  %v346_v39 = vmul.f32 %v331_v49, %v725_v9  ;;  %v353_v55 = vmul.f32 %v331_v49, %v717_v5 }
  0xb5   :  { %v135_v23 = vsel %vm134_vm3, %v133_v16, %v128_v17  ;;  %v354_v57 = vmul.f32 %v331_v49, %v719_v6 }
  0xb6   :  { %v156_v24 = vsel %vm155_vm4, %v154_v22, %v135_v23 }
  0xb7   :  { %553 = vmatmul.mubr.msk.f32.vlgmr.msra.gmra.mrb[0].mxu0 %vm157_vm5, %v156_v24  ;;  %v336_v51 = vpop.permute.xlu1 %335 }
  0xb8   :  { %v326_v50 = vpop.permute.xlu0 %325  ;;  %v347_v59 = vmul.f32 %v336_v51, %v735_v14  ;;  %v348_v61 = vmul.f32 %v336_v51, %v737_v15  ;;  %v355_v3 = vmul.f32 %v336_v51, %v731_v12  ;;  %v356_v10 = vmul.f32 %v336_v51, %v733_v13 }
  0xb9   :  { %v343_v53 = vmul.f32 %v326_v50, %v711_v2  ;;  %v344_v54 = vmul.f32 %v326_v50, %v715_v4  ;;  %v351_v56 = vmul.f32 %v326_v50, %v707_v0  ;;  %v352_v58 = vmul.f32 %v326_v50, %v709_v1 }
  0xbb   :  { %v359_v60 = vadd.f32 %v345_v52, %v343_v53  ;;  %v368_v62 = vadd.f32 %v346_v39, %v344_v54  ;;  %v341_v63 = vpop.permute.xlu1 %340  ;;  %v377_v7 = vadd.f32 %v353_v55, %v351_v56  ;;  %v386_v11 = vadd.f32 %v354_v57, %v352_v58 }
  0xbc   :  { %v349_v16 = vmul.f32 %v341_v63, %v747_v20  ;;  %v350_v22 = vmul.f32 %v341_v63, %v749_v21  ;;  %v357_v24 = vmul.f32 %v341_v63, %v743_v18  ;;  %v358_v26 = vmul.f32 %v341_v63, %v745_v19 }
  0xbd   :  { %v360_v17 = vadd.f32 %v359_v60, %v347_v59  ;;  %v369_v23 = vadd.f32 %v368_v62, %v348_v61  ;;  %v378_v25 = vadd.f32 %v377_v7, %v355_v3  ;;  %v387_v27 = vadd.f32 %v386_v11, %v356_v10 }
  0xbe   :  { %v396_v39 = vstv %s852_s6  ;;  %s516_s6 = sshll.u32 %s651_s5, 4  ;;  %s517_s6 = int_to_ptr.vmem [resolvable:$true] %s516_s6 }
  0xbf   :  { %v361_v28 = vadd.f32 %v360_v17, %v349_v16  ;;  %v370_v29 = vadd.f32 %v369_v23, %v350_v22  ;;  %v379_v30 = vadd.f32 %v378_v25, %v357_v24  ;;  %s618_s13 = scalar_lea.vmem %s517_s6, 2048  ;;  %p623_p9 = scmp.lt.s32.totalorder %s517_s6, %s517_s6 }
  0xc0   :  { %p619_p8 = scmp.ne.s32.totalorder %s517_s6, %s618_s13  ;;  %p624_p10 = scmp.lt.s32.totalorder %s618_s13, %s618_s13 }
  0xc2   :  { %p625_p11 = por %p624_p10, %p623_p9 }
  0xc4   :  { %p626_p12 = pnand %p625_p11, %p619_p8 }
 0x18a   :  { %v226_v32 = vpop.f32.mrb[0].mxu0 }
 0x18b   :  { %v227_v33 = vadd.f32 %v528_v31, %v226_v32  ;;  %v554_v34 = vpop.f32.mrb[1].mxu0  ;;  %v388_v31 = vadd.f32 %v387_v27, %v358_v26  ;;  %v362_v32 = vrot.slane %v361_v28, 4 }
 0x18c   :  { %v380_v34 = vrot.slane %v379_v30, 4 }
 0x18d   :  { %v230_v35 = vmax.f32 %v227_v33, 0.0  ;;  %v371_v33 = vrot.slane %v370_v29, 4 }
 0x18f   :  { %558 = vmatmul.mubr.msk.f32.vlgmr.msra.gmra.mrb[0].mxu1 %vm239_vm6, %v230_v35  ;;  %v389_v35 = vrot.slane %v388_v31, 4 }
 0x262   :  { %v309_v37 = vpop.f32.mrb[0].mxu1 }
 0x263   :  { %v310_v38 = vadd.f32 %v530_v36, %v309_v37  ;;  %v559_v40 = vpop.f32.mrb[1].mxu1  ;;  %v363_v36 = vadd.f32 %v362_v32, %v361_v28  ;;  %v372_v37 = vadd.f32 %v371_v33, %v370_v29 }
 0x264   :  { %v390_v40 = vadd.f32 %v389_v35, %v388_v31 }
 0x265   :  { %v532_v41 = vmul.f32 -1.442695, %v310_v38  ;;  %v381_v38 = vadd.f32 %v380_v34, %v379_v30 }
 0x267   :  { %576 = vpow2.f32 %v532_v41  ;;  %v364_v41 = vrot.slane %v363_v36, 2 }
 0x271   :  { %v577_v42 = vpop.eup %576 }
 0x272   :  { %v316_v43 = vadd.f32 1.0, %v577_v42  ;;  %v373_v42 = vrot.slane %v372_v37, 2 }
 0x274   :  { %578 = vrcp.f32 %v316_v43  ;;  %v382_v43 = vrot.slane %v381_v38, 2 }
 0x27e   :  { %v579_v46 = vpop.eup %578 }
 0x27f   :  { %v447_v47 = vrot.slane %v579_v46, %v446_v44  ;;  %v428_v48 = vrot.slane %v579_v46, %v427_v45  ;;  %v391_v44 = vrot.slane %v390_v40, 2  ;;  %v365_v45 = vadd.f32 %v364_v41, %v363_v36 }
 0x280   :  { %v374_v46 = vadd.f32 %v373_v42, %v372_v37 }
 0x281   :  { %453 = vbcast.lane.b32.xlu0 %v447_v47, 264  ;;  %430 = vbcast.lane.b32.xlu1 %v428_v48, 256  ;;  %v366_v49 = vrot.slane %v365_v45, 1 }
 0x282   :  { %v375_v50 = vrot.slane %v374_v46, 1 }
 0x283   :  { %v367_v53 = vadd.f32 %v366_v49, %v365_v45 }
 0x284   :  { %v376_v54 = vadd.f32 %v375_v50, %v374_v46 }
 0x285   :  { %461 = vbcast.lane.b32.xlu0 %v447_v47, 280  ;;  %434 = vbcast.lane.b32.xlu1 %v428_v48, 264  ;;  %v397_v57 = vadd.f32 %v396_v39, %v367_v53 }
 0x286   :  { %v398_v58 = vadd.f32 %v396_v39, %v376_v54 }
 0x287   :  { %v533_v61 = vmul.f32 -1.442695, %v397_v57 }
 0x288   :  { %v534_v62 = vmul.f32 -1.442695, %v398_v58 }
 0x289   :  { %438 = vbcast.lane.b32.xlu1 %v428_v48, 272  ;;  %580 = vpow2.f32 %v533_v61 }
 0x28a   :  { %582 = vpow2.f32 %v534_v62 }
 0x28d   :  { %442 = vbcast.lane.b32.xlu1 %v428_v48, 280  ;;  %v392_v48 = vadd.f32 %v391_v44, %v390_v40 }
 0x28f   :  { %v393_v52 = vrot.slane %v392_v48, 1 }
 0x291   :  { %449 = vbcast.lane.b32.xlu1 %v447_v47, 256  ;;  %v394_v56 = vadd.f32 %v393_v52, %v392_v48 }
 0x293   :  { %v400_v60 = vadd.f32 %v396_v39, %v394_v56  ;;  %v581_v7 = vpop.eup %580 }
 0x294   :  { %v583_v10 = vpop.eup %582  ;;  %v413_v17 = vadd.f32 1.0, %v581_v7 }
 0x295   :  { %457 = vbcast.lane.b32.xlu1 %v447_v47, 272  ;;  %v383_v47 = vadd.f32 %v382_v43, %v381_v38  ;;  %v536_v3 = vmul.f32 -1.442695, %v400_v60  ;;  %v414_v22 = vadd.f32 1.0, %v583_v10 }
 0x297   :  { %v384_v51 = vrot.slane %v383_v47, 1 }
 0x299   :  { %v385_v55 = vadd.f32 %v384_v51, %v383_v47 }
 0x29b   :  { %v399_v59 = vadd.f32 %v396_v39, %v385_v55 }
 0x29d   :  { %v535_v63 = vmul.f32 -1.442695, %v399_v59 }
 0x29f   :  { %584 = vpow2.f32 %v535_v63 }
 0x2a0   :  { %586 = vpow2.f32 %v536_v3 }
 0x2a1   :  { %588 = vrcp.f32 %v413_v17 }
 0x2a2   :  { %590 = vrcp.f32 %v414_v22 }
 0x2a9   :  { %v585_v11 = vpop.eup %584 }
 0x2aa   :  { %v587_v16 = vpop.eup %586  ;;  %v415_v23 = vadd.f32 1.0, %v585_v11 }
 0x2ab   :  { %v416_v24 = vadd.f32 1.0, %v587_v16  ;;  %v589_v25 = vpop.eup %588 }
 0x2ac   :  { %592 = vrcp.f32 %v415_v23  ;;  %v591_v26 = vpop.eup %590 }
 0x2ad   :  { %594 = vrcp.f32 %v416_v24 }
 0x2b6   :  { %v593_v27 = vpop.eup %592 }
 0x2b7   :  { %v595_v28 = vpop.eup %594 }
 0x2f3   :  { %v431_v29 = vpop.permute.xlu1 %430  ;;  %v454_v30 = vpop.permute.xlu0 %453 }
 0x2f4   :  { %v463_v31 = vadd.f32 %v589_v25, %v431_v29  ;;  %v464_v32 = vadd.f32 %v591_v26, %v431_v29  ;;  %v473_v33 = vadd.f32 %v593_v27, %v454_v30  ;;  %v474_v34 = vadd.f32 %v595_v28, %v454_v30 }
 0x2f6   :  { %v479_v35 = vmul.f32 %v463_v31, %v711_v2  ;;  %v480_v36 = vmul.f32 %v464_v32, %v715_v4  ;;  %v489_v37 = vmul.f32 %v473_v33, %v717_v5  ;;  %v490_v38 = vmul.f32 %v474_v34, %v719_v6 }
 0x2f7   :  { %v435_v40 = vpop.permute.xlu1 %434  ;;  %v462_v41 = vpop.permute.xlu0 %461 }
 0x2f8   :  { %495 = vst [vmem:[#allocation6] sm:$0xff] %v479_v35  ;;  %496 = vst [vmem:[#allocation6 + $0x8] sm:$0xff] %v480_v36  ;;  %v465_v42 = vadd.f32 %v589_v25, %v435_v40  ;;  %v466_v43 = vadd.f32 %v591_v26, %v435_v40  ;;  %v477_v44 = vadd.f32 %v593_v27, %v462_v41 }
 0x2f9   :  { %505 = vst [vmem:[#allocation6 + $0x50] sm:$0xff] %v489_v37  ;;  %506 = vst [vmem:[#allocation6 + $0x58] sm:$0xff] %v490_v38  ;;  %v478_v45 = vadd.f32 %v595_v28, %v462_v41 }
 0x2fa   :  { %v481_v46 = vmul.f32 %v465_v42, %v723_v8  ;;  %v482_v2 = vmul.f32 %v466_v43, %v725_v9  ;;  %v493_v4 = vmul.f32 %v477_v44, %v743_v18 }
 0x2fb   :  { %v494_v5 = vmul.f32 %v478_v45, %v745_v19  ;;  %v439_v47 = vpop.permute.xlu1 %438 }
 0x2fc   :  { %497 = vst [vmem:[#allocation6 + $0x10] sm:$0xff] %v481_v46  ;;  %498 = vst [vmem:[#allocation6 + $0x18] sm:$0xff] %v482_v2  ;;  %v467_v6 = vadd.f32 %v589_v25, %v439_v47  ;;  %v468_v48 = vadd.f32 %v591_v26, %v439_v47 }
 0x2fd   :  { %509 = vst [vmem:[#allocation6 + $0x70] sm:$0xff] %v493_v4  ;;  %510 = vst [vmem:[#allocation6 + $0x78] sm:$0xff] %v494_v5 }
 0x2fe   :  { %v483_v49 = vmul.f32 %v467_v6, %v735_v14  ;;  %v484_v50 = vmul.f32 %v468_v48, %v737_v15 }
 0x2ff   :  { %v443_v51 = vpop.permute.xlu1 %442 }
 0x300   :  { %499 = vst [vmem:[#allocation6 + $0x20] sm:$0xff] %v483_v49  ;;  %500 = vst [vmem:[#allocation6 + $0x28] sm:$0xff] %v484_v50  ;;  %v469_v8 = vadd.f32 %v589_v25, %v443_v51  ;;  %v470_v9 = vadd.f32 %v591_v26, %v443_v51 }
 0x302   :  { %v485_v18 = vmul.f32 %v469_v8, %v747_v20  ;;  %v486_v19 = vmul.f32 %v470_v9, %v749_v21 }
 0x303   :  { %v450_v52 = vpop.permute.xlu1 %449 }
 0x304   :  { %501 = vst [vmem:[#allocation6 + $0x30] sm:$0xff] %v485_v18  ;;  %502 = vst [vmem:[#allocation6 + $0x38] sm:$0xff] %v486_v19  ;;  %v471_v53 = vadd.f32 %v593_v27, %v450_v52  ;;  %v472_v39 = vadd.f32 %v595_v28, %v450_v52 }
 0x306   :  { %v487_v54 = vmul.f32 %v471_v53, %v707_v0  ;;  %v488_v14 = vmul.f32 %v472_v39, %v709_v1 }
 0x307   :  { %v458_v55 = vpop.permute.xlu1 %457 }
 0x308   :  { %503 = vst [vmem:[#allocation6 + $0x40] sm:$0xff] %v487_v54  ;;  %504 = vst [vmem:[#allocation6 + $0x48] sm:$0xff] %v488_v14  ;;  %v475_v15 = vadd.f32 %v593_v27, %v458_v55  ;;  %v476_v56 = vadd.f32 %v595_v28, %v458_v55 }
 0x30a   :  { %v491_v20 = vmul.f32 %v475_v15, %v731_v12  ;;  %v492_v21 = vmul.f32 %v476_v56, %v733_v13 }
 0x30c   :  { %507 = vst [vmem:[#allocation6 + $0x60] sm:$0xff] %v491_v20  ;;  %508 = vst [vmem:[#allocation6 + $0x68] sm:$0xff] %v492_v21 }
 0x30d   :  { %629 = shalt.err (!%p626_p12)
}
 0x30e   :  { %s630_s15 = scalar_lea.hbm %s853_s7, 2048 }
 0x30f   :  { %p631_p13 = scmp.ne.s32.totalorder %s853_s7, %s630_s15  ;;  %p634_p0 = scmp.lt.u32.totalorder %s630_s15, %s853_s7 }
 0x311   :  { %p636_p1 = pnand %p634_p0, %p631_p13 }
 0x313   :  { %639 = shalt.err (!%p636_p1)
}
 0x314   :  { %522 = dma.vmem_to_hbm [thread:$0]  %s517_s6, 2048, %s853_s7, [#allocation5], %s645_s11, %s645_s11, %s646_s12  }
 0x315   :  { %642 = dma.done.wait [#allocation5], 2048  }
 0x316   :  { %643 = vsyncadd [#allocation5], 4294965248 }
 0x317   :  { %526 = vsyncpa [#allocation4], 1 }
 0x318   :  { %527 = vsyncpa [#allocation5], 1 }

</bundles_post_ra>
